<compile_context>
chip_gen: v7x
topology: tpu7x:2x2x1
jax: 0.10.0
libtpu: 0.0.40
codegen_flags: <defaults>
</compile_context>

<pallas_src>
import jax
import jax.numpy as jnp
from jax.experimental import pallas as pl
from jax.experimental.pallas import tpu as pltpu

K = 7   # conv kernel size
P = 3   # padding


def _sa_kernel(x_ref, m_ref, b_ref, o_ref, acc_ref):
    # x_ref:   (Nb, Ct, HW)    one C-tile of Nb batch rows (lane-dense)
    # m_ref:   (2*HW, HW)      stacked conv matrix [m_avg ; m_max] (resident)
    # b_ref:   (1,)  SMEM      conv bias
    # o_ref:   (Nb, 1, HW)     lane-dense output slab
    # acc_ref: (Nb, 2*HW) f32  lanes [0,HW)=channel-sum, [HW,2HW)=channel-max
    c = pl.program_id(1)
    nb = o_ref.shape[0]
    hw = o_ref.shape[2]

    @pl.when(c == 0)
    def _():
        acc_ref[:, :hw] = jnp.zeros((nb, hw), jnp.float32)
        acc_ref[:, hw:] = jnp.full((nb, hw), -jnp.inf, jnp.float32)

    # Vectorized channel reduction over the whole block (no per-row loop, no
    # masked single-sublane stores).  Max path stays in the input dtype
    # (bf16-native VALU on v6e/v7x); sum path accumulates in f32.
    xb = x_ref[...]                                              # (Nb, Ct, HW)
    acc_ref[:, :hw] = acc_ref[:, :hw] + jnp.sum(xb.astype(jnp.float32), axis=1)
    acc_ref[:, hw:] = jnp.maximum(acc_ref[:, hw:],
                                  jnp.max(xb, axis=1).astype(jnp.float32))

    # Last C step: fused 7x7 conv as ONE MXU matmul (contraction = 2*HW),
    # then bias + sigmoid, stored as one lane-dense block.
    @pl.when(c == pl.num_programs(1) - 1)
    def _():
        lhs = acc_ref[...].astype(m_ref.dtype)                   # (Nb, 2*HW)
        res = jnp.dot(lhs, m_ref[...], preferred_element_type=jnp.float32)
        res = res + b_ref[0]
        o_ref[...] = jax.nn.sigmoid(res)[:, None, :].astype(o_ref.dtype)


def _conv_matrix(w2d, H, W):
    """Dense (H*W, H*W) matrix M with M[ri*W+ci, ro*W+co] = w2d[ri-ro+P, ci-co+P]
    (zero outside the 7x7 support), so that flat_out = flat_in @ M equals a
    stride-1, pad-3 'same' 2-D cross-correlation with w2d (PyTorch conv2d)."""
    dr = jnp.arange(H)[:, None] - jnp.arange(H)[None, :] + P     # (H, H) [ri, ro]
    dc = jnp.arange(W)[:, None] - jnp.arange(W)[None, :] + P     # (W, W) [ci, co]
    vr = (dr >= 0) & (dr < K)
    vc = (dc >= 0) & (dc < K)
    vals = w2d[jnp.clip(dr, 0, K - 1)[:, :, None, None],
               jnp.clip(dc, 0, K - 1)[None, None, :, :]]         # (H, H, W, W)
    vals = jnp.where(vr[:, :, None, None] & vc[None, None, :, :], vals, 0.0)
    # reorder to [ri, ci, ro, co] and flatten both pairs.
    return jnp.transpose(vals, (0, 2, 1, 3)).reshape(H * W, H * W).astype(jnp.float32)


def _vmem_capacity_bytes():
    try:
        return int(getattr(pltpu.get_tpu_info(), "vmem_capacity_bytes", 64 * 2**20))
    except Exception:
        return 64 * 2**20   # conservative (v7x-sized) fallback


def _choose_tiles(N, C, HW, itemsize, vmem_cap):
    # Per-x-block budget: the double-buffered x input should stay <= ~1/4 of
    # VMEM (generation-aware: ~16 MiB blocks on v5e/v6e's 128 MiB, ~8 MiB on
    # v7x's 64 MiB).
    x_block_budget = vmem_cap // 8
    # C tile is the second-to-last dim of the x block, so it must stay a
    # multiple of 8 (or equal C) per the (8,128) rule.
    ct = C
    while (ct * HW * itemsize > x_block_budget and ct % 2 == 0
           and (ct // 2) % 8 == 0):
        ct //= 2
    # Batch tile is a leading block dim -> no (8,128) constraint.  Cap at N//2
    # when N is even so the "parallel" N axis has >= 2 grid steps (both v7x TCs).
    nb = N // 2 if (N >= 2 and N % 2 == 0) else N
    while nb * ct * HW * itemsize > x_block_budget and nb % 2 == 0:
        nb //= 2
    return nb, ct


@jax.jit
def spatial_attention(x, weight, bias):
    """x: (N, C, H, W); weight: (1, 2, 7, 7); bias: (1,). Returns (N, 1, H, W)."""
    N, C, H, W = x.shape
    HW = H * W
    x_flat = x.reshape(N, C, HW)                                 # lane-dense slab

    # Fold conv + zero-pad + 1/C (mean) into one stacked block-Toeplitz matrix.
    # bf16 matrix for bf16 inputs (bf16-native MXU on v6e/v7x); f32 otherwise.
    mat_dtype = jnp.bfloat16 if x.dtype == jnp.bfloat16 else jnp.float32
    mat_itemsize = 2 if mat_dtype == jnp.bfloat16 else 4
    w = weight.astype(jnp.float32).reshape(2, K, K)
    m = jnp.concatenate([_conv_matrix(w[0] / C, H, W),           # 1/C mean fold
                         _conv_matrix(w[1], H, W)], axis=0).astype(mat_dtype)
    b = bias.astype(jnp.float32).reshape(1)

    vmem_cap = _vmem_capacity_bytes()
    nb, ct = _choose_tiles(N, C, HW, x.dtype.itemsize, vmem_cap)
    grid = (N // nb, C // ct)

    need = (2 * nb * ct * HW * x.dtype.itemsize                  # x (double-buffered)
            + 2 * 2 * HW * HW * mat_itemsize                     # stacked conv matrix
            + 2 * nb * HW * x.dtype.itemsize                     # output block
            + nb * 2 * HW * 4)                                   # f32 accumulator
    vmem_limit = int(min(vmem_cap - 8 * 2**20,                   # headroom for Mosaic
                         max(32 * 2**20, need + 8 * 2**20)))

    # TODO(synk): once validated on HW, sweep pipeline_mode=pl.Buffered(1) on the
    #             constant conv-matrix spec and pl.Buffered(3) on the x spec.
    # TODO(synk): for HW >~ 4096 switch the dense (2*HW, HW) conv matrix to a
    #             banded per-row-offset matmul; for N == 1 on v7x add a spatial
    #             parallel axis with halo so both TensorCores are used.
    out_flat = pl.pallas_call(
        _sa_kernel,
        out_shape=jax.ShapeDtypeStruct((N, 1, HW), x.dtype),
        grid=grid,
        in_specs=[
            pl.BlockSpec((nb, ct, HW), lambda n, c: (n, c, 0)),
            pl.BlockSpec((2 * HW, HW), lambda n, c: (0, 0)),
            pl.BlockSpec(memory_space=pltpu.MemorySpace.SMEM),
        ],
        out_specs=pl.BlockSpec((nb, 1, HW), lambda n, c: (n, 0, 0)),
        scratch_shapes=[pltpu.VMEM((nb, 2 * HW), jnp.float32)],
        compiler_params=pltpu.CompilerParams(
            dimension_semantics=("parallel", "arbitrary"),
            vmem_limit_bytes=vmem_limit),
    )(x_flat, m, b)

    return out_flat.reshape(N, 1, H, W)


def _reference(x, weight, bias):
    # Pure-JAX reference (NCHW conv) to validate the kernel.
    avg = jnp.mean(x, axis=1, keepdims=True)
    mx = jnp.max(x, axis=1, keepdims=True)
    cat = jnp.concatenate([avg, mx], axis=1)                     # (N, 2, H, W)
    out = jax.lax.conv_general_dilated(
        cat, weight, window_strides=(1, 1), padding=((P, P), (P, P)),
        dimension_numbers=("NCHW", "OIHW", "NCHW"))
    out = out + bias.reshape(1, 1, 1, 1)
    return jax.nn.sigmoid(out)


if __name__ == "__main__":
    key = jax.random.PRNGKey(0)
    kx, kw, kb = jax.random.split(key, 3)

    N, C, H, W = 2, 4, 16, 16
    x = jax.random.normal(kx, (N, C, H, W), dtype=jnp.float32)

    # Deterministic parameter init (PyTorch-style uniform bound for Conv2d:
    # fan_in = 2 * 7 * 7).
    fan_in = 2 * K * K
    bound = 1.0 / (fan_in ** 0.5)
    weight = jax.random.uniform(kw, (1, 2, K, K), jnp.float32, -bound, bound)
    bias = jax.random.uniform(kb, (1,), jnp.float32, -bound, bound)

    out = spatial_attention(x, weight, bias)
    out = jax.block_until_ready(out)

    ref = _reference(x, weight, bias)
    assert out.shape == (N, 1, H, W)
    err = jnp.max(jnp.abs(out - ref))
    assert jnp.allclose(out, ref, atol=1e-3, rtol=1e-3), f"max abs err = {err}"

    print("KERNEL_OK")
</pallas_src>

<mosaic_0001>
module attributes {stable_mosaic.version = 11 : i64} {
  func.func @_sa_kernel(%arg0: i32, %arg1: i32, %arg2: memref<1x4x256xf32, #tpu.memory_space<vmem>>, %arg3: memref<512x256xf32, #tpu.memory_space<vmem>>, %arg4: memref<1xf32, #tpu.memory_space<smem>>, %arg5: memref<1x1x256xf32, #tpu.memory_space<vmem>>, %arg6: memref<1x512xf32, #tpu.memory_space<vmem>>) attributes {dimension_semantics = [#tpu.dimension_semantics<parallel>, #tpu.dimension_semantics<arbitrary>], iteration_bounds = array<i64: 2, 1>, scalar_prefetch = 0 : i64, scratch_operands = 1 : i64, tpu.core_type = #tpu.core_type<tc>, window_params = [{transform_indices = @transform_0, window_bounds = array<i64: 1, 4, 256>}, {pipeline_mode = #tpu.pipeline_mode<synchronous>, transform_indices = @transform_1, window_bounds = array<i64: 512, 256>}, {transform_indices = @transform_2, window_bounds = array<i64: 1>}, {transform_indices = @transform_3, window_bounds = array<i64: 1, 1, 256>}]} {
    %c0_i32 = arith.constant 0 : i32
    %0 = arith.cmpi eq, %arg1, %c0_i32 : i32
    %1 = arith.extui %0 : i1 to i32
    %c0_i32_0 = arith.constant 0 : i32
    %2 = arith.cmpi ne, %1, %c0_i32_0 : i32
    scf.if %2 {
      %cst_13 = arith.constant 0.000000e+00 : f32
      %15 = vector.broadcast %cst_13 : f32 to vector<1x256xf32>
      %c0_14 = arith.constant 0 : index
      %c0_15 = arith.constant 0 : index
      %16 = vector.load %arg6[%c0_14, %c0_15] : memref<1x512xf32, #tpu.memory_space<vmem>>, vector<1x256xf32>
      tpu.vector_store %arg6[%c0_14, %c0_15], %15 {strides = array<i32>} : memref<1x512xf32, #tpu.memory_space<vmem>>, vector<1x256xf32>,
      %cst_16 = arith.constant 0xFF800000 : f32
      %17 = vector.broadcast %cst_16 : f32 to vector<1x256xf32>
      %c0_17 = arith.constant 0 : index
      %c256_18 = arith.constant 256 : index
      %18 = vector.load %arg6[%c0_17, %c256_18] : memref<1x512xf32, #tpu.memory_space<vmem>>, vector<1x256xf32>
      tpu.vector_store %arg6[%c0_17, %c256_18], %17 {strides = array<i32>} : memref<1x512xf32, #tpu.memory_space<vmem>>, vector<1x256xf32>,
    } else {
    }
    %c0 = arith.constant 0 : index
    %c0_1 = arith.constant 0 : index
    %c0_2 = arith.constant 0 : index
    %3 = vector.load %arg2[%c0, %c0_1, %c0_2] : memref<1x4x256xf32, #tpu.memory_space<vmem>>, vector<1x4x256xf32>
    %c0_3 = arith.constant 0 : index
    %c0_4 = arith.constant 0 : index
    %4 = vector.load %arg6[%c0_3, %c0_4] : memref<1x512xf32, #tpu.memory_space<vmem>>, vector<1x256xf32>
    %cst = arith.constant dense<0.000000e+00> : vector<1x256xf32>
    %5 = vector.multi_reduction <add>, %3, %cst [1] : vector<1x4x256xf32> to vector<1x256xf32>
    %6 = arith.addf %4, %5 : vector<1x256xf32>
    %c0_5 = arith.constant 0 : index
    %c0_6 = arith.constant 0 : index
    %7 = vector.load %arg6[%c0_5, %c0_6] : memref<1x512xf32, #tpu.memory_space<vmem>>, vector<1x256xf32>
    tpu.vector_store %arg6[%c0_5, %c0_6], %6 {strides = array<i32>} : memref<1x512xf32, #tpu.memory_space<vmem>>, vector<1x256xf32>,
    %c0_7 = arith.constant 0 : index
    %c256 = arith.constant 256 : index
    %8 = vector.load %arg6[%c0_7, %c256] : memref<1x512xf32, #tpu.memory_space<vmem>>, vector<1x256xf32>
    %cst_8 = arith.constant dense<0xFF800000> : vector<1x256xf32>
    %9 = vector.multi_reduction <maximumf>, %3, %cst_8 [1] : vector<1x4x256xf32> to vector<1x256xf32>
    %10 = arith.maximumf %8, %9 : vector<1x256xf32>
    %c0_9 = arith.constant 0 : index
    %c256_10 = arith.constant 256 : index
    %11 = vector.load %arg6[%c0_9, %c256_10] : memref<1x512xf32, #tpu.memory_space<vmem>>, vector<1x256xf32>
    tpu.vector_store %arg6[%c0_9, %c256_10], %10 {strides = array<i32>} : memref<1x512xf32, #tpu.memory_space<vmem>>, vector<1x256xf32>,
    %c0_i32_11 = arith.constant 0 : i32
    %12 = arith.cmpi eq, %arg1, %c0_i32_11 : i32
    %13 = arith.extui %12 : i1 to i32
    %c0_i32_12 = arith.constant 0 : i32
    %14 = arith.cmpi ne, %13, %c0_i32_12 : i32
    scf.if %14 {
      %c0_13 = arith.constant 0 : index
      %c0_14 = arith.constant 0 : index
      %15 = vector.load %arg6[%c0_13, %c0_14] : memref<1x512xf32, #tpu.memory_space<vmem>>, vector<1x512xf32>
      %c0_15 = arith.constant 0 : index
      %c0_16 = arith.constant 0 : index
      %16 = vector.load %arg3[%c0_15, %c0_16] : memref<512x256xf32, #tpu.memory_space<vmem>>, vector<512x256xf32>
      %cst_17 = arith.constant dense<0.000000e+00> : vector<1x256xf32>
      %17 = tpu.matmul %15, %16, %cst_17 {dimension_numbers = #tpu.dot_dimension_numbers<[1], [0], [0], [1], [0, 0, 1, 1], [], []>} : vector<1x512xf32>, vector<512x256xf32>, vector<1x256xf32> -> vector<1x256xf32>
      %c0_18 = arith.constant 0 : index
      %18 = memref.load %arg4[%c0_18] : memref<1xf32, #tpu.memory_space<smem>>
      %19 = vector.broadcast %18 : f32 to vector<1x256xf32>
      %20 = arith.addf %17, %19 : vector<1x256xf32>
      %21 = arith.negf %20 : vector<1x256xf32>
      %22 = math.exp %21 : vector<1x256xf32>
      %cst_19 = arith.constant 1.000000e+00 : f32
      %23 = vector.broadcast %cst_19 : f32 to vector<1x256xf32>
      %24 = arith.addf %23, %22 : vector<1x256xf32>
      %25 = arith.divf %23, %24 : vector<1x256xf32>
      %26 = vector.shape_cast %25 : vector<1x256xf32> to vector<1x1x256xf32>
      %c0_20 = arith.constant 0 : index
      %c0_21 = arith.constant 0 : index
      %c0_22 = arith.constant 0 : index
      %27 = vector.load %arg5[%c0_20, %c0_21, %c0_22] : memref<1x1x256xf32, #tpu.memory_space<vmem>>, vector<1x1x256xf32>
      tpu.vector_store %arg5[%c0_20, %c0_21, %c0_22], %26 {strides = array<i32>} : memref<1x1x256xf32, #tpu.memory_space<vmem>>, vector<1x1x256xf32>,
    } else {
    }
    return
  }
  func.func @transform_0(%arg0: i32, %arg1: i32) -> (i32, i32, i32) {
    %c0_i32 = arith.constant 0 : i32
    %c0_i32_0 = arith.constant 0 : i32
    return %arg0, %arg1, %c0_i32 : i32, i32, i32
  }
  func.func @transform_1(%arg0: i32, %arg1: i32) -> (i32, i32) {
    %c0_i32 = arith.constant 0 : i32
    %c0_i32_0 = arith.constant 0 : i32
    %c0_i32_1 = arith.constant 0 : i32
    return %c0_i32, %c0_i32_0 : i32, i32
  }
  func.func @transform_2(%arg0: i32, %arg1: i32) -> i32 {
    %c0_i32 = arith.constant 0 : i32
    %c0_i32_0 = arith.constant 0 : i32
    return %c0_i32 : i32
  }
  func.func @transform_3(%arg0: i32, %arg1: i32) -> (i32, i32, i32) {
    %c0_i32 = arith.constant 0 : i32
    %c0_i32_0 = arith.constant 0 : i32
    %c0_i32_1 = arith.constant 0 : i32
    return %arg0, %c0_i32, %c0_i32_0 : i32, i32, i32
  }
}

</mosaic_0001>

<bundles_post_ra>
// kernel: spatial_attention.1
= control target key start
LH: loop header
LB: loop body
LE: loop exit
PB: predicated region body
PF: predicated region fallthrough
CT: control target
= control target key end

     0   :  { %s914_s14 = smov 0   ;;  %s916_s15 = smov 0   ;;  %s1376_s0 = inlined_call_operand.vmem [shape: f32[2,4,256], index: 0, kind: input, shape index: {}]   ;;  %s1377_s1 = inlined_call_operand.vmem [shape: f32[512,256], index: 1, kind: input, shape index: {}]   ;;  %s1378_s2 = inlined_call_operand.<no memory space> [shape: f32[1], index: 2, kind: input, shape index: {}]   ;;  %s1379_s3 = inlined_call_operand.vmem [shape: f32[2,1,256], index: 3, kind: output, shape index: {}]  }
   0x1   :  { %8 = sst [smem:[#allocation3]] %s1378_s2  ;;  %s918_s16 = smov 0  }
   0x2 LB: > { %s26_s2 = sadd.s32 1, %s882_s15  ;;  %p687_p0 = scmp.ge.s32.totalorder %s886_s16, 1  ;;  %s886_s16 = sphi %s918_s16, %s14_s16   ;;  %s882_s15 = sphi %s916_s15, %s1383_s15   ;;  %s878_s14 = sphi %s914_s14, %s1382_s14  }
   0x3   : > { %p28_p1 = scmp.ge.s32.totalorder %s26_s2, 2  ;;  %p156_p2 = scmp.lt.s32.totalorder %s886_s16, 3 }
   0x5   : > { %s1385_s2 = smov (%p28_p1, %s26_s2), 0  ;;  %p157_p3 = pnand %p687_p0, %p156_p2 }
   0x6   : > { %v290_v0 = vld [vmem:[%s1377_s1 + $0x8] sm:$0xff] (!%p157_p3)  ;;  %v292_v1 = vld [vmem:[%s1377_s1 + $0x18] sm:$0xff] (!%p157_p3)  ;;  %v289_v2 = vld [vmem:[%s1377_s1] sm:$0xff] (!%p157_p3)  ;;  %v200_v3 = vlaneseq (!%p157_p3)  ;;  %v888_v18 = vmov (!%p157_p3), 0.0   ;;  %v889_v19 = vmov (!%p157_p3), -inf   ;;  %p183_p4 = scmp.lt.s32.totalorder (!%p157_p3), %s878_s14, 1 }
   0x7   : > { %160 = sbr.rel (%p157_p3) target bundleno = 325 (0x145), region = 32  ;;  %v696_v4 = vpack.c.bf16 (!%p157_p3), %v292_v1, %v290_v0  ;;  %v291_v5 = vld [vmem:[%s1377_s1 + $0x10] sm:$0xff] (!%p157_p3)  ;;  %v354_v6 = vld [vmem:[%s1377_s1 + $0x208] sm:$0xff] (!%p157_p3)  ;;  %v356_v7 = vld [vmem:[%s1377_s1 + $0x218] sm:$0xff] (!%p157_p3)  ;;  %vm211_vm1 = vcmask (!%p157_p3), 1043456   ;;  %s417_s10 = sld [smem:[#allocation3]] (!%p157_p3) }
   0x8   : > { %v698_v8 = vpack.c.bf16 (!%p157_p3), %v291_v5, %v289_v2  ;;  %v760_v9 = vpack.c.bf16 (!%p157_p3), %v356_v7, %v354_v6  ;;  %v353_v10 = vld [vmem:[%s1377_s1 + $0x200] sm:$0xff] (!%p157_p3)  ;;  %v355_v11 = vld [vmem:[%s1377_s1 + $0x210] sm:$0xff] (!%p157_p3)  ;;  %v294_v12 = vld [vmem:[%s1377_s1 + $0x28] sm:$0xff] (!%p157_p3)  ;;  %vm962_vm0 = vcmp.lt.s32.totalorder (!%p157_p3), %v200_v3, 256 }
   0x9   : > { %697 = vmatprep.subr.bf16.mxu1 (!%p157_p3), %v696_v4  ;;  %v762_v14 = vpack.c.bf16 (!%p157_p3), %v355_v11, %v353_v10  ;;  %v296_v15 = vld [vmem:[%s1377_s1 + $0x38] sm:$0xff] (!%p157_p3)  ;;  %v293_v16 = vld [vmem:[%s1377_s1 + $0x20] sm:$0xff] (!%p157_p3)  ;;  %v295_v17 = vld [vmem:[%s1377_s1 + $0x30] sm:$0xff] (!%p157_p3)  ;;  %204 = vst.msk [vmem:[#allocation2] sm:$0x3] (!%p157_p3), %vm962_vm0, %v888_v18 }
   0xa   : > { %205 = vst.msk [vmem:[#allocation2 + $0x2] sm:$0x3] (!%p157_p3), %vm962_vm0, %v889_v19  ;;  %699 = vmatpush1.bf16.msra.mxu1 (!%p157_p3), %v698_v8  ;;  %761 = vmatprep.subr.bf16.mxu0 (!%p157_p3), %v760_v9  ;;  %v700_v20 = vpack.c.bf16 (!%p157_p3), %v296_v15, %v294_v12  ;;  %v702_v21 = vpack.c.bf16 (!%p157_p3), %v295_v17, %v293_v16  ;;  %v358_v22 = vld [vmem:[%s1377_s1 + $0x228] sm:$0xff] (!%p157_p3)  ;;  %v360_v23 = vld [vmem:[%s1377_s1 + $0x238] sm:$0xff] (!%p157_p3)  ;;  %v357_v24 = vld [vmem:[%s1377_s1 + $0x220] sm:$0xff] (!%p157_p3) }
   0xb   : > { %763 = vmatpush1.bf16.msra.mxu0 (!%p157_p3), %v762_v14  ;;  %v764_v25 = vpack.c.bf16 (!%p157_p3), %v360_v23, %v358_v22  ;;  %v359_v26 = vld [vmem:[%s1377_s1 + $0x230] sm:$0xff] (!%p157_p3)  ;;  %v298_v27 = vld [vmem:[%s1377_s1 + $0x48] sm:$0xff] (!%p157_p3)  ;;  %v300_v28 = vld [vmem:[%s1377_s1 + $0x58] sm:$0xff] (!%p157_p3) }
   0xc   : > { %701 = vmatprep.subr.bf16.mxu1 (!%p157_p3), %v700_v20  ;;  %v766_v29 = vpack.c.bf16 (!%p157_p3), %v359_v26, %v357_v24  ;;  %v704_v30 = vpack.c.bf16 (!%p157_p3), %v300_v28, %v298_v27  ;;  %v297_v31 = vld [vmem:[%s1377_s1 + $0x40] sm:$0xff] (!%p157_p3)  ;;  %v299_v32 = vld [vmem:[%s1377_s1 + $0x50] sm:$0xff] (!%p157_p3)  ;;  %v362_v33 = vld [vmem:[%s1377_s1 + $0x248] sm:$0xff] (!%p157_p3) }
   0xd   : > { %765 = vmatprep.subr.bf16.mxu0 (!%p157_p3), %v764_v25  ;;  %v364_v34 = vld [vmem:[%s1377_s1 + $0x258] sm:$0xff] (!%p157_p3)  ;;  %v361_v35 = vld [vmem:[%s1377_s1 + $0x240] sm:$0xff] (!%p157_p3)  ;;  %v363_v36 = vld [vmem:[%s1377_s1 + $0x250] sm:$0xff] (!%p157_p3)  ;;  %v706_v37 = vpack.c.bf16 (!%p157_p3), %v299_v32, %v297_v31 }
   0xe   : > { %703 = vmatpush1.bf16.msra.mxu1 %v702_v21  ;;  %v768_v38 = vpack.c.bf16 %v364_v34, %v362_v33  ;;  %v302_v39 = vld [vmem:[%s1377_s1 + $0x68] sm:$0xff]  ;;  %v304_v40 = vld [vmem:[%s1377_s1 + $0x78] sm:$0xff]  ;;  %v301_v41 = vld [vmem:[%s1377_s1 + $0x60] sm:$0xff]  ;;  %v770_v42 = vpack.c.bf16 %v363_v36, %v361_v35  ;;  %s1387_s14 = smov (!%p183_p4, %s878_s14), 1 }
   0xf   : > { %767 = vmatpush1.bf16.msra.mxu0 %v766_v29  ;;  %705 = vmatprep.subr.bf16.mxu1 %v704_v30  ;;  %v708_v43 = vpack.c.bf16 %v304_v40, %v302_v39  ;;  %v303_v44 = vld [vmem:[%s1377_s1 + $0x70] sm:$0xff]  ;;  %v366_v45 = vld [vmem:[%s1377_s1 + $0x268] sm:$0xff]  ;;  %v368_v46 = vld [vmem:[%s1377_s1 + $0x278] sm:$0xff]  ;;  %s695_s17 = sshll.u32 %s1387_s14, 3  ;;  %s690_s11 = sshll.u32 %s1387_s14, 1 }
  0x10   : > { %769 = vmatprep.subr.bf16.mxu0 %v768_v38  ;;  %v772_v47 = vpack.c.bf16 %v368_v46, %v366_v45  ;;  %v365_v48 = vld [vmem:[%s1377_s1 + $0x260] sm:$0xff]  ;;  %v367_v49 = vld [vmem:[%s1377_s1 + $0x270] sm:$0xff]  ;;  %v306_v50 = vld [vmem:[%s1377_s1 + $0x88] sm:$0xff]  ;;  %v710_v52 = vpack.c.bf16 %v303_v44, %v301_v41  ;;  %s191_s9 = scalar_lea.vmem %s1376_s0, %s695_s17  ;;  %s195_s18 = scalar_lea.vmem %s1379_s3, %s690_s11 }
  0x11   : > { %v308_v51 = vld [vmem:[%s1377_s1 + $0x98] sm:$0xff]  ;;  %v370_v53 = vld [vmem:[%s1377_s1 + $0x288] sm:$0xff]  ;;  %v774_v55 = vpack.c.bf16 %v367_v49, %v365_v48  ;;  %v305_v57 = vld [vmem:[%s1377_s1 + $0x80] sm:$0xff] }
  0x12   : > { %707 = vmatpush1.bf16.msra.mxu1 %v706_v37  ;;  %v372_v54 = vld [vmem:[%s1377_s1 + $0x298] sm:$0xff]  ;;  %v712_v56 = vpack.c.bf16 %v308_v51, %v306_v50  ;;  %v307_v58 = vld [vmem:[%s1377_s1 + $0x90] sm:$0xff]  ;;  %v369_v59 = vld [vmem:[%s1377_s1 + $0x280] sm:$0xff] }
  0x13   : > { %771 = vmatpush1.bf16.msra.mxu0 %v770_v42  ;;  %709 = vmatprep.subr.bf16.mxu1 %v708_v43  ;;  %v776_v60 = vpack.c.bf16 %v372_v54, %v370_v53  ;;  %v371_v61 = vld [vmem:[%s1377_s1 + $0x290] sm:$0xff]  ;;  %v310_v62 = vld [vmem:[%s1377_s1 + $0xa8] sm:$0xff]  ;;  %v312_v63 = vld [vmem:[%s1377_s1 + $0xb8] sm:$0xff]  ;;  %v714_v2 = vpack.c.bf16 %v307_v58, %v305_v57 }
  0x14   : > { %773 = vmatprep.subr.bf16.mxu0 %v772_v47  ;;  %v374_v0 = vld [vmem:[%s1377_s1 + $0x2a8] sm:$0xff]  ;;  %v376_v1 = vld [vmem:[%s1377_s1 + $0x2b8] sm:$0xff]  ;;  %v778_v4 = vpack.c.bf16 %v371_v61, %v369_v59  ;;  %v716_v5 = vpack.c.bf16 %v312_v63, %v310_v62  ;;  %v309_v6 = vld [vmem:[%s1377_s1 + $0xa0] sm:$0xff] }
  0x15   : > { %v311_v7 = vld [vmem:[%s1377_s1 + $0xb0] sm:$0xff]  ;;  %v373_v8 = vld [vmem:[%s1377_s1 + $0x2a0] sm:$0xff]  ;;  %v780_v9 = vpack.c.bf16 %v376_v1, %v374_v0  ;;  %v314_v11 = vld [vmem:[%s1377_s1 + $0xc8] sm:$0xff] }
  0x16   : > { %711 = vmatpush1.bf16.msra.mxu1 %v710_v52  ;;  %v375_v10 = vld [vmem:[%s1377_s1 + $0x2b0] sm:$0xff]  ;;  %v316_v12 = vld [vmem:[%s1377_s1 + $0xd8] sm:$0xff]  ;;  %v378_v14 = vld [vmem:[%s1377_s1 + $0x2c8] sm:$0xff]  ;;  %v718_v16 = vpack.c.bf16 %v311_v7, %v309_v6 }
  0x17   : > { %775 = vmatpush1.bf16.msra.mxu0 %v774_v55  ;;  %713 = vmatprep.subr.bf16.mxu1 %v712_v56  ;;  %v380_v15 = vld [vmem:[%s1377_s1 + $0x2d8] sm:$0xff]  ;;  %v782_v17 = vpack.c.bf16 %v375_v10, %v373_v8  ;;  %v720_v18 = vpack.c.bf16 %v316_v12, %v314_v11  ;;  %v313_v19 = vld [vmem:[%s1377_s1 + $0xc0] sm:$0xff]  ;;  %v315_v20 = vld [vmem:[%s1377_s1 + $0xd0] sm:$0xff] }
  0x18   : > { %777 = vmatprep.subr.bf16.mxu0 %v776_v60  ;;  %v377_v21 = vld [vmem:[%s1377_s1 + $0x2c0] sm:$0xff]  ;;  %v784_v22 = vpack.c.bf16 %v380_v15, %v378_v14  ;;  %v379_v23 = vld [vmem:[%s1377_s1 + $0x2d0] sm:$0xff]  ;;  %v318_v24 = vld [vmem:[%s1377_s1 + $0xe8] sm:$0xff]  ;;  %v722_v28 = vpack.c.bf16 %v315_v20, %v313_v19 }
  0x19   : > { %v320_v25 = vld [vmem:[%s1377_s1 + $0xf8] sm:$0xff]  ;;  %v382_v26 = vld [vmem:[%s1377_s1 + $0x2e8] sm:$0xff]  ;;  %v786_v29 = vpack.c.bf16 %v379_v23, %v377_v21  ;;  %v317_v31 = vld [vmem:[%s1377_s1 + $0xe0] sm:$0xff] }
  0x1a   : > { %715 = vmatpush1.bf16.msra.mxu1 %v714_v2  ;;  %v384_v27 = vld [vmem:[%s1377_s1 + $0x2f8] sm:$0xff]  ;;  %v724_v30 = vpack.c.bf16 %v320_v25, %v318_v24  ;;  %v319_v32 = vld [vmem:[%s1377_s1 + $0xf0] sm:$0xff]  ;;  %v381_v33 = vld [vmem:[%s1377_s1 + $0x2e0] sm:$0xff] }
  0x1b   : > { %779 = vmatpush1.bf16.msra.mxu0 %v778_v4  ;;  %717 = vmatprep.subr.bf16.mxu1 %v716_v5  ;;  %v788_v34 = vpack.c.bf16 %v384_v27, %v382_v26  ;;  %v383_v35 = vld [vmem:[%s1377_s1 + $0x2f0] sm:$0xff]  ;;  %v322_v36 = vld [vmem:[%s1377_s1 + $0x108] sm:$0xff]  ;;  %v324_v37 = vld [vmem:[%s1377_s1 + $0x118] sm:$0xff]  ;;  %v726_v40 = vpack.c.bf16 %v319_v32, %v317_v31 }
  0x1c   : > { %781 = vmatprep.subr.bf16.mxu0 %v780_v9  ;;  %v386_v38 = vld [vmem:[%s1377_s1 + $0x308] sm:$0xff]  ;;  %v388_v39 = vld [vmem:[%s1377_s1 + $0x318] sm:$0xff]  ;;  %v790_v41 = vpack.c.bf16 %v383_v35, %v381_v33  ;;  %v728_v42 = vpack.c.bf16 %v324_v37, %v322_v36  ;;  %v321_v43 = vld [vmem:[%s1377_s1 + $0x100] sm:$0xff] }
  0x1d   : > { %v323_v44 = vld [vmem:[%s1377_s1 + $0x110] sm:$0xff]  ;;  %v385_v45 = vld [vmem:[%s1377_s1 + $0x300] sm:$0xff]  ;;  %v792_v46 = vpack.c.bf16 %v388_v39, %v386_v38  ;;  %v326_v48 = vld [vmem:[%s1377_s1 + $0x128] sm:$0xff] }
  0x1e   : > { %719 = vmatpush1.bf16.msra.mxu1 %v718_v16  ;;  %v387_v47 = vld [vmem:[%s1377_s1 + $0x310] sm:$0xff]  ;;  %v328_v49 = vld [vmem:[%s1377_s1 + $0x138] sm:$0xff]  ;;  %v390_v50 = vld [vmem:[%s1377_s1 + $0x328] sm:$0xff]  ;;  %v730_v52 = vpack.c.bf16 %v323_v44, %v321_v43 }
  0x1f   : > { %783 = vmatpush1.bf16.msra.mxu0 %v782_v17  ;;  %721 = vmatprep.subr.bf16.mxu1 %v720_v18  ;;  %v392_v51 = vld [vmem:[%s1377_s1 + $0x338] sm:$0xff]  ;;  %v794_v53 = vpack.c.bf16 %v387_v47, %v385_v45  ;;  %v732_v54 = vpack.c.bf16 %v328_v49, %v326_v48  ;;  %v325_v55 = vld [vmem:[%s1377_s1 + $0x120] sm:$0xff]  ;;  %v327_v56 = vld [vmem:[%s1377_s1 + $0x130] sm:$0xff] }
  0x20   : > { %785 = vmatprep.subr.bf16.mxu0 %v784_v22  ;;  %v389_v57 = vld [vmem:[%s1377_s1 + $0x320] sm:$0xff]  ;;  %v796_v58 = vpack.c.bf16 %v392_v51, %v390_v50  ;;  %v391_v59 = vld [vmem:[%s1377_s1 + $0x330] sm:$0xff]  ;;  %v330_v60 = vld [vmem:[%s1377_s1 + $0x148] sm:$0xff]  ;;  %v734_v0 = vpack.c.bf16 %v327_v56, %v325_v55  ;;  %v890_v51 = vmov 1966171168  }
  0x21   : > { %v332_v61 = vld [vmem:[%s1377_s1 + $0x158] sm:$0xff]  ;;  %v394_v62 = vld [vmem:[%s1377_s1 + $0x348] sm:$0xff]  ;;  %v798_v1 = vpack.c.bf16 %v391_v59, %v389_v57  ;;  %v329_v4 = vld [vmem:[%s1377_s1 + $0x140] sm:$0xff] }
  0x22   : > { %723 = vmatpush1.bf16.msra.mxu1 %v722_v28  ;;  %v396_v63 = vld [vmem:[%s1377_s1 + $0x358] sm:$0xff]  ;;  %v736_v2 = vpack.c.bf16 %v332_v61, %v330_v60  ;;  %v331_v5 = vld [vmem:[%s1377_s1 + $0x150] sm:$0xff]  ;;  %v393_v6 = vld [vmem:[%s1377_s1 + $0x340] sm:$0xff] }
  0x23   : > { %787 = vmatpush1.bf16.msra.mxu0 %v786_v29  ;;  %725 = vmatprep.subr.bf16.mxu1 %v724_v30  ;;  %v800_v7 = vpack.c.bf16 %v396_v63, %v394_v62  ;;  %v395_v8 = vld [vmem:[%s1377_s1 + $0x350] sm:$0xff]  ;;  %v334_v9 = vld [vmem:[%s1377_s1 + $0x168] sm:$0xff]  ;;  %v336_v10 = vld [vmem:[%s1377_s1 + $0x178] sm:$0xff]  ;;  %v738_v14 = vpack.c.bf16 %v331_v5, %v329_v4 }
  0x24   : > { %789 = vmatprep.subr.bf16.mxu0 %v788_v34  ;;  %v398_v11 = vld [vmem:[%s1377_s1 + $0x368] sm:$0xff]  ;;  %v400_v12 = vld [vmem:[%s1377_s1 + $0x378] sm:$0xff]  ;;  %v333_v15 = vld [vmem:[%s1377_s1 + $0x160] sm:$0xff]  ;;  %v802_v18 = vpack.c.bf16 %v395_v8, %v393_v6  ;;  %v740_v19 = vpack.c.bf16 %v336_v10, %v334_v9 }
  0x25   : > { %v335_v16 = vld [vmem:[%s1377_s1 + $0x170] sm:$0xff]  ;;  %v397_v17 = vld [vmem:[%s1377_s1 + $0x360] sm:$0xff]  ;;  %v338_v21 = vld [vmem:[%s1377_s1 + $0x188] sm:$0xff]  ;;  %v804_v23 = vpack.c.bf16 %v400_v12, %v398_v11  ;;  %v1306_v11 = vshrl.u32 %v200_v3, 7 }
  0x26   : > { %727 = vmatpush1.bf16.msra.mxu1 %v726_v40  ;;  %v399_v20 = vld [vmem:[%s1377_s1 + $0x370] sm:$0xff]  ;;  %v340_v22 = vld [vmem:[%s1377_s1 + $0x198] sm:$0xff]  ;;  %v402_v24 = vld [vmem:[%s1377_s1 + $0x388] sm:$0xff]  ;;  %v742_v30 = vpack.c.bf16 %v335_v16, %v333_v15 }
  0x27   : > { %791 = vmatpush1.bf16.msra.mxu0 %v790_v41  ;;  %729 = vmatprep.subr.bf16.mxu1 %v728_v42  ;;  %v404_v25 = vld [vmem:[%s1377_s1 + $0x398] sm:$0xff]  ;;  %v206_v26 = vld [vmem:[%s191_s9] sm:$0xff]  ;;  %v806_v31 = vpack.c.bf16 %v399_v20, %v397_v17  ;;  %v339_v33 = vld [vmem:[%s1377_s1 + $0x190] sm:$0xff]  ;;  %v744_v36 = vpack.c.bf16 %v340_v22, %v338_v21 }
  0x28   : > { %793 = vmatprep.subr.bf16.mxu0 %v792_v46  ;;  %v209_v27 = vcombine.high %v206_v26, %v206_v26  ;;  %v212_v28 = vsel %vm211_vm1, %v206_v26, 0.0  ;;  %v251_v29 = vsel %vm211_vm1, %v206_v26, -inf  ;;  %v337_v32 = vld [vmem:[%s1377_s1 + $0x180] sm:$0xff]  ;;  %v808_v37 = vpack.c.bf16 %v404_v25, %v402_v24  ;;  %v403_v39 = vld [vmem:[%s1377_s1 + $0x390] sm:$0xff]  ;;  %v342_v40 = vld [vmem:[%s1377_s1 + $0x1a8] sm:$0xff] }
  0x29   : > { %v213_v34 = vrot.slane %v212_v28, 4  ;;  %v252_v35 = vrot.slane %v251_v29, 4  ;;  %v401_v38 = vld [vmem:[%s1377_s1 + $0x380] sm:$0xff]  ;;  %v344_v43 = vld [vmem:[%s1377_s1 + $0x1b8] sm:$0xff]  ;;  %v406_v44 = vld [vmem:[%s1377_s1 + $0x3a8] sm:$0xff]  ;;  %v746_v50 = vpack.c.bf16 %v339_v33, %v337_v32 }
  0x2a   : > { %731 = vmatpush1.bf16.msra.mxu1 %v730_v52  ;;  %v219_v41 = vsel %vm211_vm1, %v209_v27, 0.0  ;;  %v258_v42 = vsel %vm211_vm1, %v209_v27, -inf  ;;  %v408_v45 = vld [vmem:[%s1377_s1 + $0x3b8] sm:$0xff]  ;;  %v230_v52 = vunpack.c.l.s4 %v890_v51  ;;  %v810_v59 = vpack.c.bf16 %v403_v39, %v401_v38  ;;  %v405_v62 = vld [vmem:[%s1377_s1 + $0x3a0] sm:$0xff]  ;;  %v407_v63 = vld [vmem:[%s1377_s1 + $0x3b0] sm:$0xff] }
  0x2b   : > { %795 = vmatpush1.bf16.msra.mxu0 %v794_v53  ;;  %733 = vmatprep.subr.bf16.mxu1 %v732_v54  ;;  %v214_v46 = vadd.f32 %v213_v34, %v212_v28  ;;  %v220_v47 = vrot.slane %v219_v41, 4  ;;  %v253_v48 = vmax.f32 %v251_v29, %v252_v35  ;;  %v259_v49 = vrot.slane %v258_v42, 4  ;;  %v341_v53 = vld [vmem:[%s1377_s1 + $0x1a0] sm:$0xff]  ;;  %v343_v54 = vld [vmem:[%s1377_s1 + $0x1b0] sm:$0xff]  ;;  %v412_v4 = vld [vmem:[%s1377_s1 + $0x3d8] sm:$0xff] }
  0x2c   : > { %797 = vmatprep.subr.bf16.mxu0 %v796_v58  ;;  %v748_v60 = vpack.c.bf16 %v344_v43, %v342_v40  ;;  %v812_v61 = vpack.c.bf16 %v408_v45, %v406_v44  ;;  %v750_v9 = vpack.c.bf16 %v343_v54, %v341_v53  ;;  %v231_v10 = vunpack.c.0.s8 %v230_v52  ;;  %v347_v20 = vld [vmem:[%s1377_s1 + $0x1d0] sm:$0xff]  ;;  %v409_v3 = vld [vmem:[%s1377_s1 + $0x3c0] sm:$0xff]  ;;  %v352_v24 = vld [vmem:[%s1377_s1 + $0x1f8] sm:$0xff] }
  0x2d   : > { %v215_v55 = vrot.slane %v214_v46, 2  ;;  %v221_v56 = vadd.f32 %v220_v47, %v219_v41  ;;  %v254_v57 = vrot.slane %v253_v48, 2  ;;  %v260_v58 = vmax.f32 %v258_v42, %v259_v49  ;;  %v411_v22 = vld [vmem:[%s1377_s1 + $0x3d0] sm:$0xff]  ;;  %v414_v29 = vld [vmem:[%s1377_s1 + $0x3e8] sm:$0xff]  ;;  %v413_v40 = vld [vmem:[%s1377_s1 + $0x3e0] sm:$0xff] }
  0x2e   : > { %735 = vmatpush1.bf16.msra.mxu1 %v734_v0  ;;  %v346_v0 = vld [vmem:[%s1377_s1 + $0x1c8] sm:$0xff]  ;;  %v814_v17 = vpack.c.bf16 %v407_v63, %v405_v62  ;;  %v1333_v33 = vsub.s32 %v231_v10, %v1306_v11  ;;  %v818_v35 = vpack.c.bf16 %v411_v22, %v409_v3  ;;  %v351_v38 = vld [vmem:[%s1377_s1 + $0x1f0] sm:$0xff]  ;;  %v250_v49 = vld [vmem:[#allocation2 + $0x2] sm:$0x3]  ;;  %v426_v54 = vsub.s32 1, %v1306_v11 }
  0x2f   : > { %799 = vmatpush1.bf16.msra.mxu0 %v798_v1  ;;  %737 = vmatprep.subr.bf16.mxu1 %v736_v2  ;;  %v348_v1 = vld [vmem:[%s1377_s1 + $0x1d8] sm:$0xff]  ;;  %v410_v2 = vld [vmem:[%s1377_s1 + $0x3c8] sm:$0xff]  ;;  %v216_v5 = vadd.f32 %v215_v55, %v214_v46  ;;  %v222_v6 = vrot.slane %v221_v56, 2  ;;  %v261_v8 = vrot.slane %v260_v58, 2  ;;  %v415_v41 = vld [vmem:[%s1377_s1 + $0x3f0] sm:$0xff]  ;;  %v422_v55 = vsub.s32 0, %v1306_v11 }
  0x30   : > { %801 = vmatprep.subr.bf16.mxu0 %v800_v7  ;;  %v255_v7 = vmax.f32 %v253_v48, %v254_v57  ;;  %v816_v21 = vpack.c.bf16 %v412_v4, %v410_v2  ;;  %v822_v47 = vpack.c.bf16 %v415_v41, %v413_v40  ;;  %v207_v48 = vld [vmem:[#allocation2] sm:$0x3]  ;;  %v430_v57 = vsub.s32 2, %v1306_v11 }
  0x31   : > { %v217_v12 = vrot.slane %v216_v5, 1  ;;  %v262_v16 = vmax.f32 %v260_v58, %v261_v8  ;;  %v418_v63 = vstv %s417_s10 }
  0x32   : > { %739 = vmatpush1.bf16.msra.mxu1 %v738_v14  ;;  %v223_v14 = vadd.f32 %v222_v6, %v221_v56  ;;  %v256_v15 = vrot.slane %v255_v7, 1  ;;  %v434_v56 = vsub.s32 3, %v1306_v11 }
  0x33   : > { %803 = vmatpush1.bf16.msra.mxu0 %v802_v18  ;;  %741 = vmatprep.subr.bf16.mxu1 %v740_v19  ;;  %v752_v18 = vpack.c.bf16 %v348_v1, %v346_v0  ;;  %v345_v19 = vld [vmem:[%s1377_s1 + $0x1c0] sm:$0xff]  ;;  %v218_v25 = vadd.f32 %v217_v12, %v216_v5  ;;  %v263_v28 = vrot.slane %v262_v16, 1 }
  0x34   : > { %805 = vmatprep.subr.bf16.mxu0 %v804_v23  ;;  %v350_v23 = vld [vmem:[%s1377_s1 + $0x1e8] sm:$0xff]  ;;  %v224_v26 = vrot.slane %v223_v14, 1  ;;  %v257_v27 = vmax.f32 %v255_v7, %v256_v15 }
  0x35   : > { %v264_v34 = vmax.f32 %v262_v16, %v263_v28 }
  0x36   : > { %743 = vmatpush1.bf16.msra.mxu1 %v742_v30  ;;  %v416_v30 = vld [vmem:[%s1377_s1 + $0x3f8] sm:$0xff]  ;;  %v225_v32 = vadd.f32 %v224_v26, %v223_v14 }
  0x37   : > { %807 = vmatpush1.bf16.msra.mxu0 %v806_v31  ;;  %745 = vmatprep.subr.bf16.mxu1 %v744_v36  ;;  %v754_v31 = vpack.c.bf16 %v347_v20, %v345_v19  ;;  %v756_v36 = vpack.c.bf16 %v352_v24, %v350_v23  ;;  %v820_v39 = vpack.c.bf16 %v416_v30, %v414_v29 }
  0x38   : > { %809 = vmatprep.subr.bf16.mxu0 %v808_v37  ;;  %v349_v37 = vld [vmem:[%s1377_s1 + $0x1e0] sm:$0xff]  ;;  %v228_v42 = vcombine.low %v218_v25, %v225_v32  ;;  %v267_v43 = vcombine.low %v257_v27, %v264_v34 }
  0x39   : > { %v758_v44 = vpack.c.bf16 %v351_v38, %v349_v37 }
  0x3a   : > { %747 = vmatpush1.bf16.msra.mxu1 %v746_v50  ;;  %v235_v45 = vrot.slane %v228_v42, %v1333_v33  ;;  %v274_v46 = vrot.slane %v267_v43, %v1333_v33 }
  0x3b   : > { %811 = vmatpush1.bf16.msra.mxu0 %v810_v59  ;;  %749 = vmatprep.subr.bf16.mxu1 %v748_v60 }
  0x3c   : > { %813 = vmatprep.subr.bf16.mxu0 %v812_v61  ;;  %v242_v50 = vrot.slane %v235_v45, %v1333_v33  ;;  %v281_v51 = vrot.slane %v274_v46, %v1333_v33 }
  0x3e   : > { %751 = vmatpush1.bf16.msra.mxu1 %v750_v9  ;;  %v244_v52 = vadd.f32 %v242_v50, %v207_v48  ;;  %v283_v53 = vmax.f32 %v250_v49, %v281_v51 }
  0x3f   : > { %815 = vmatpush1.bf16.msra.mxu0 %v814_v17  ;;  %753 = vmatprep.subr.bf16.mxu1 %v752_v18 }
  0x40   : > { %817 = vmatprep.subr.bf16.mxu0 %v816_v21  ;;  %249 = vst.msk [vmem:[#allocation2] sm:$0x3] %vm962_vm0, %v244_v52  ;;  %284 = vst.msk [vmem:[#allocation2 + $0x2] sm:$0x3] %vm962_vm0, %v283_v53 }
  0x42   : > { %755 = vmatpush1.bf16.msra.mxu1 %v754_v31 }
  0x43   : > { %819 = vmatpush1.bf16.msra.mxu0 %v818_v35  ;;  %757 = vmatprep.subr.bf16.mxu1 %v756_v36 }
  0x44   : > { %821 = vmatprep.subr.bf16.mxu0 %v820_v39 }
  0x46   : > { %759 = vmatpush1.bf16.msra.mxu1 %v758_v44 }
  0x47   : > { %823 = vmatpush1.bf16.msra.mxu0 %v822_v47  ;;  %v288_v58 = vld [vmem:[#allocation2] sm:$0xf] }
  0x48   : > { %v427_v59 = vrot.slane %v288_v58, %v426_v54  ;;  %v423_v60 = vrot.slane %v288_v58, %v422_v55  ;;  %v435_v61 = vrot.slane %v288_v58, %v434_v56  ;;  %v431_v62 = vrot.slane %v288_v58, %v430_v57 }
  0x4a   : > { %504 = vmatprep.mubr.f32.mxu1 %v427_v59  ;;  %575 = vmatprep.mubr.f32.mxu0 %v435_v61 }
  0x4b   : > { %505 = vmatmul.mubr.f32.vlgmr.msra.gmra.mrb[0].mxu1 %v423_v60  ;;  %576 = vmatmul.mubr.f32.vlgmr.msra.gmra.mrb[0].mxu0 %v431_v62 }
 0x11e   : > { %v506_v0 = vpop.f32.mrb[0].mxu1  ;;  %v577_v1 = vpop.f32.mrb[0].mxu0 }
 0x11f   : > { %v507_v2 = vadd.f32 %v506_v0, %v418_v63  ;;  %v508_v4 = vpop.f32.mrb[1].mxu1  ;;  %v579_v5 = vpop.f32.mrb[1].mxu0 }
 0x120   : > { %v509_v6 = vadd.f32 %v508_v4, %v418_v63 }
 0x121   : > { %v578_v7 = vadd.f32 %v577_v1, %v507_v2 }
 0x122   : > { %v580_v8 = vadd.f32 %v579_v5, %v509_v6 }
 0x123   : > { %v691_v9 = vmul.f32 -1.442695, %v578_v7 }
 0x124   : > { %v692_v10 = vmul.f32 -1.442695, %v580_v8 }
 0x125   : > { %856 = vpow2.f32 %v691_v9 }
 0x126   : > { %858 = vpow2.f32 %v692_v10 }
 0x12f   : > { %v857_v11 = vpop.eup %856 }
 0x130   : > { %v859_v12 = vpop.eup %858  ;;  %v588_v14 = vadd.f32 1.0, %v857_v11 }
 0x131   : > { %v589_v15 = vadd.f32 1.0, %v859_v12 }
 0x132   : > { %860 = vrcp.f32 %v588_v14 }
 0x133   : > { %862 = vrcp.f32 %v589_v15 }
 0x13c   : > { %v861_v16 = vpop.eup %860 }
 0x13d   : > { %v863_v17 = vpop.eup %862 }
 0x13e   : > { %v596_v18 = vcombine.low %v861_v16, %v863_v17 }
 0x140   : > { %v603_v19 = vrot.slane %v596_v18, %v1333_v33 }
 0x142   : > { %v610_v20 = vrot.slane %v603_v19, %v1333_v33 }
 0x144   : > { %612 = vst.msk [vmem:[%s195_s18] sm:$0x3] %vm962_vm0, %v610_v20 }
 0x145 PF: > { %s14_s16 = sadd.s32 1, %s886_s16   ;;  %s1382_s14 = smov %s882_s15 }
 0x146   : > { %p11_p5 = scmp.ge.s32.totalorder %s14_s16, 4   ;;  %s1383_s15 = smov %s1385_s2 }
 0x148   :  { %13 = sbr.rel (!%p11_p5) target bundleno = 2 (0x2), region = 70 }

</bundles_post_ra>
